<compile_context>
chip_gen: v6e
topology: v6e:2x2x1
jax: 0.10.0
libtpu: 0.0.40
codegen_flags: <defaults>
</compile_context>

<pallas_src>
import functools

import jax
import jax.numpy as jnp
from jax.experimental import pallas as pl
from jax.experimental.pallas import tpu as pltpu


LANE = 128
_VMEM_SPEC = pl.BlockSpec(memory_space=pltpu.MemorySpace.VMEM)


def _round_up(x, m):
    return ((x + m - 1) // m) * m


def _pad_to(a, shape):
    out = jnp.zeros(shape, a.dtype)
    return out.at[tuple(slice(0, s) for s in a.shape)].set(a)


# ----------------------------------------------------------------------------
# Kernels
# ----------------------------------------------------------------------------

def _branch_kernel(num_extra, adj_ref, x_ref, w1_ref, b1_ref, wl_ref, bl_ref,
                   pool_ref, o_ref):
    """One SAGE branch: all layers + ReLU + global_add_pool, fully in VMEM.

    adj_ref : (Np, Np)  bf16  row-normalized adjacency (mean aggregation)
    x_ref   : (Np, Fp)  bf16  node features (feature-padded)
    w1_ref  : (2*Fp, Hp) bf16 [W_l ; W_r] of layer 1
    b1_ref  : (1, Hp)   f32
    wl_ref  : (L-1, 2*Hp, Hp) bf16 stacked [W_l ; W_r] of layers 2..L
    bl_ref  : (L-1, 1, Hp)    f32
    pool_ref: (Gp, Np)  bf16  pooling matrix (global_add_pool)
    o_ref   : (Gp, Hp)  f32   pooled branch features
    """
    a = adj_ref[...]
    h = x_ref[...]

    def sage_layer(h_in, w, b):
        # mean-neighbor aggregation (MXU), f32 accumulate
        agg = jnp.dot(a, h_in, preferred_element_type=jnp.float32)
        # merged weight matmul:  [agg | x] @ [W_l ; W_r]  (single MXU pass, K doubled)
        cat = jnp.concatenate([agg.astype(jnp.bfloat16), h_in], axis=-1)
        z = jnp.dot(cat, w, preferred_element_type=jnp.float32) + b
        return jnp.maximum(z, 0.0).astype(jnp.bfloat16)

    h = sage_layer(h, w1_ref[...], b1_ref[...])
    for layer in range(num_extra):                      # static unrolled loop
        h = sage_layer(h, wl_ref[layer], bl_ref[layer])

    # fused global_add_pool: P @ h  (rides in the slack of the last layer)
    o_ref[...] = jnp.dot(pool_ref[...], h, preferred_element_type=jnp.float32)


def _head_kernel(num_classes, x_ref, w1_ref, b1_ref, w2_ref, b2_ref,
                 w3_ref, b3_ref, o_ref):
    """MLP head on the pooled [sc | fc] slab, with masked log_softmax (padded classes)."""
    h = jnp.dot(x_ref[...], w1_ref[...], preferred_element_type=jnp.float32) + b1_ref[...]
    h = jnp.maximum(h, 0.0)
    # dropout(p=args.dropout) is identity in eval mode
    h = jnp.dot(h, w2_ref[...], preferred_element_type=jnp.float32) + b2_ref[...]
    h = jnp.maximum(h, 0.0)
    logits = jnp.dot(h, w3_ref[...], preferred_element_type=jnp.float32) + b3_ref[...]

    col = jax.lax.broadcasted_iota(jnp.int32, logits.shape, 1)
    logits = jnp.where(col < num_classes, logits, -1e30)

    m = jnp.max(logits, axis=-1, keepdims=True)
    z = logits - m
    lse = jnp.log(jnp.sum(jnp.exp(z), axis=-1, keepdims=True))
    o_ref[...] = z - lse


# ----------------------------------------------------------------------------
# Wrappers
# ----------------------------------------------------------------------------

def branch_forward(adj2, x2, w1, b1, wl, bl, pool, *, num_extra, g_pad, h_pad):
    """Runs both SAGE branches (grid axis of size 2, 'parallel') and returns the
    pooled, already-concatenated (Gp, 2*Hp) slab: branch b writes columns [b*Hp, (b+1)*Hp)."""
    n_pad = adj2.shape[1]
    f_pad = x2.shape[2]
    lm1 = wl.shape[1]

    kernel = functools.partial(_branch_kernel, num_extra)
    return pl.pallas_call(
        kernel,
        out_shape=jax.ShapeDtypeStruct((g_pad, 2 * h_pad), jnp.float32),
        grid=(2,),
        in_specs=[
            pl.BlockSpec((None, n_pad, n_pad), lambda b: (b, 0, 0)),        # adj
            pl.BlockSpec((None, n_pad, f_pad), lambda b: (b, 0, 0)),        # x
            pl.BlockSpec((None, 2 * f_pad, h_pad), lambda b: (b, 0, 0)),    # W layer 1
            pl.BlockSpec((None, 1, h_pad), lambda b: (b, 0, 0)),            # b layer 1
            pl.BlockSpec((None, lm1, 2 * h_pad, h_pad), lambda b: (b, 0, 0, 0)),  # W layers 2..L
            pl.BlockSpec((None, lm1, 1, h_pad), lambda b: (b, 0, 0, 0)),          # b layers 2..L
            pl.BlockSpec((g_pad, n_pad), lambda b: (0, 0)),                 # pool matrix
        ],
        out_specs=pl.BlockSpec((g_pad, h_pad), lambda b: (0, b)),
        compiler_params=pltpu.CompilerParams(dimension_semantics=("parallel",)),
    )(adj2, x2, w1, b1, wl, bl, pool)


def mlp_head(x, w1, b1, w2, b2, w3, b3, *, num_classes):
    g_pad = x.shape[0]
    c_pad = w3.shape[1]
    kernel = functools.partial(_head_kernel, num_classes)
    return pl.pallas_call(
        kernel,
        out_shape=jax.ShapeDtypeStruct((g_pad, c_pad), jnp.float32),
        in_specs=[_VMEM_SPEC] * 7,
        out_specs=_VMEM_SPEC,
    )(x, w1, b1, w2, b2, w3, b3)


# ----------------------------------------------------------------------------
# Plain-JAX glue: dense aggregation / pooling operators from edge_index
# ----------------------------------------------------------------------------
# TODO(synk): for large sparse graphs replace dense A@X with a CSR gather path
# (PrefetchScalarGridSpec + make_async_copy); dense is fine at these sizes.

def build_mean_adjacency(edge_index, num_nodes):
    """A[i, j] = 1/deg_in(i) if there is an edge j -> i (source_to_target flow)."""
    src = edge_index[0]
    dst = edge_index[1]
    a = jnp.zeros((num_nodes, num_nodes), jnp.float32).at[dst, src].add(1.0)
    deg = jnp.clip(jnp.sum(a, axis=1, keepdims=True), 1.0, None)
    return a / deg            # normalization in f32 BEFORE any bf16 cast


def build_pool_matrix(batch, num_graphs):
    return (batch[None, :] == jnp.arange(num_graphs)[:, None]).astype(jnp.float32)


# ----------------------------------------------------------------------------
# Parameter init (module-shaped) and packing into padded, MXU-friendly layout
# ----------------------------------------------------------------------------

def _sage_params(key, in_dim, out_dim):
    k1, k2 = jax.random.split(key)
    w_l = jax.random.normal(k1, (in_dim, out_dim), jnp.float32) * 0.1
    b_l = jnp.zeros((1, out_dim), jnp.float32)
    w_r = jax.random.normal(k2, (in_dim, out_dim), jnp.float32) * 0.1
    return (w_l, b_l, w_r)


def _linear_params(key, in_dim, out_dim):
    w = jax.random.normal(key, (in_dim, out_dim), jnp.float32) * 0.1
    b = jnp.zeros((1, out_dim), jnp.float32)
    return (w, b)


def init_params(key, sc_features, fc_features, hidden_dim, num_layers, num_classes):
    keys = jax.random.split(key, 2 * num_layers + 3)
    it = iter(keys)
    return {
        "sc_conv1": _sage_params(next(it), sc_features, hidden_dim),
        "sc_convs": [_sage_params(next(it), hidden_dim, hidden_dim)
                     for _ in range(num_layers - 1)],
        "fc_conv1": _sage_params(next(it), fc_features, hidden_dim),
        "fc_convs": [_sage_params(next(it), hidden_dim, hidden_dim)
                     for _ in range(num_layers - 1)],
        "fc1": _linear_params(next(it), hidden_dim * 2, hidden_dim),
        "fc2": _linear_params(next(it), hidden_dim, hidden_dim // 2),
        "fc3": _linear_params(next(it), hidden_dim // 2, num_classes),
    }


def pack_params(params, sc_features, fc_features, hidden_dim, num_layers, num_classes):
    """Pad every lane dim to 128, merge [W_l ; W_r] per SAGE layer, stack per branch,
    and cast matmul operands to bf16 (biases stay f32)."""
    f_pad = _round_up(max(sc_features, fc_features), LANE)
    h_pad = _round_up(hidden_dim, LANE)
    h2 = max(hidden_dim // 2, 1)
    h2_pad = _round_up(h2, LANE)
    c_pad = _round_up(num_classes, LANE)

    def pack_sage(p, in_dim, in_pad):
        w_l, b_l, w_r = p
        w = jnp.zeros((2 * in_pad, h_pad), jnp.float32)
        w = w.at[:in_dim, :hidden_dim].set(w_l)
        w = w.at[in_pad:in_pad + in_dim, :hidden_dim].set(w_r)
        b = jnp.zeros((1, h_pad), jnp.float32).at[:, :hidden_dim].set(b_l)
        return w.astype(jnp.bfloat16), b

    sc_w1, sc_b1 = pack_sage(params["sc_conv1"], sc_features, f_pad)
    fc_w1, fc_b1 = pack_sage(params["fc_conv1"], fc_features, f_pad)
    w1 = jnp.stack([sc_w1, fc_w1])
    b1 = jnp.stack([sc_b1, fc_b1])

    n_extra = num_layers - 1

    def pack_extra(layers):
        if n_extra == 0:
            return (jnp.zeros((1, 2 * h_pad, h_pad), jnp.bfloat16),
                    jnp.zeros((1, 1, h_pad), jnp.float32))
        ws, bs = [], []
        for p in layers:
            w, b = pack_sage(p, hidden_dim, h_pad)
            ws.append(w)
            bs.append(b)
        return jnp.stack(ws), jnp.stack(bs)

    sc_wl, sc_bl = pack_extra(params["sc_convs"])
    fc_wl, fc_bl = pack_extra(params["fc_convs"])
    wl = jnp.stack([sc_wl, fc_wl])
    bl = jnp.stack([sc_bl, fc_bl])

    # MLP head: fc1 consumes [sc_pool (H) | fc_pool (H)]; in the padded slab the
    # fc half starts at column h_pad, so split fc1's rows accordingly.
    w1h, b1h = params["fc1"]
    hw1 = jnp.zeros((2 * h_pad, h_pad), jnp.float32)
    hw1 = hw1.at[:hidden_dim, :hidden_dim].set(w1h[:hidden_dim])
    hw1 = hw1.at[h_pad:h_pad + hidden_dim, :hidden_dim].set(w1h[hidden_dim:])
    hb1 = jnp.zeros((1, h_pad), jnp.float32).at[:, :hidden_dim].set(b1h)

    w2h, b2h = params["fc2"]
    hw2 = jnp.zeros((h_pad, h2_pad), jnp.float32).at[:hidden_dim, :h2].set(w2h)
    hb2 = jnp.zeros((1, h2_pad), jnp.float32).at[:, :h2].set(b2h)

    w3h, b3h = params["fc3"]
    hw3 = jnp.zeros((h2_pad, c_pad), jnp.float32).at[:h2, :num_classes].set(w3h)
    hb3 = jnp.zeros((1, c_pad), jnp.float32).at[:, :num_classes].set(b3h)

    return {
        "w1": w1, "b1": b1, "wl": wl, "bl": bl,
        "head_w1": hw1, "head_b1": hb1,
        "head_w2": hw2, "head_b2": hb2,
        "head_w3": hw3, "head_b3": hb3,
    }


# ----------------------------------------------------------------------------
# Forward
# ----------------------------------------------------------------------------

def graphsage_forward(packed, num_layers, num_classes,
                      sc_x, sc_adj, fc_x, fc_adj, pool_mat):
    h_pad = packed["w1"].shape[2]
    f_pad = packed["w1"].shape[1] // 2

    n = sc_x.shape[0]
    g = pool_mat.shape[0]
    n_pad = _round_up(n, 16)
    g_pad = _round_up(g, 16)

    x2 = jnp.stack([_pad_to(sc_x, (n_pad, f_pad)),
                    _pad_to(fc_x, (n_pad, f_pad))]).astype(jnp.bfloat16)
    adj2 = jnp.stack([_pad_to(sc_adj, (n_pad, n_pad)),
                      _pad_to(fc_adj, (n_pad, n_pad))]).astype(jnp.bfloat16)
    poolp = _pad_to(pool_mat, (g_pad, n_pad)).astype(jnp.bfloat16)

    pooled = branch_forward(adj2, x2, packed["w1"], packed["b1"],
                            packed["wl"], packed["bl"], poolp,
                            num_extra=num_layers - 1, g_pad=g_pad, h_pad=h_pad)

    out = mlp_head(pooled, packed["head_w1"], packed["head_b1"],
                   packed["head_w2"], packed["head_b2"],
                   packed["head_w3"], packed["head_b3"],
                   num_classes=num_classes)
    return out[:g, :num_classes]


# Pure-JAX f32 reference (for a loose numerical check against the bf16 kernels).
def reference_forward(params, sc_x, sc_adj, fc_x, fc_adj, pool_mat):
    def sage(adj, x, p):
        w_l, b_l, w_r = p
        return jax.nn.relu(adj @ x @ w_l + b_l + x @ w_r)

    x = sage(sc_adj, sc_x, params["sc_conv1"])
    for p in params["sc_convs"]:
        x = sage(sc_adj, x, p)
    y = sage(fc_adj, fc_x, params["fc_conv1"])
    for p in params["fc_convs"]:
        y = sage(fc_adj, y, p)
    z = jnp.concatenate([pool_mat @ x, pool_mat @ y], axis=1)
    h = jax.nn.relu(z @ params["fc1"][0] + params["fc1"][1])
    h = jax.nn.relu(h @ params["fc2"][0] + params["fc2"][1])
    logits = h @ params["fc3"][0] + params["fc3"][1]
    return jax.nn.log_softmax(logits, axis=-1)


# ----------------------------------------------------------------------------
# Main
# ----------------------------------------------------------------------------

if __name__ == "__main__":
    SC_FEATURES = 16
    FC_FEATURES = 16
    HIDDEN_DIM = 32
    NUM_LAYERS = 2
    NUM_CLASSES = 4
    NUM_NODES = 16
    NUM_GRAPHS = 2
    NUM_EDGES = 48

    key = jax.random.PRNGKey(0)
    k_par, k_scx, k_fcx, k_sce, k_fce = jax.random.split(key, 5)

    params = init_params(k_par, SC_FEATURES, FC_FEATURES,
                         HIDDEN_DIM, NUM_LAYERS, NUM_CLASSES)
    packed = pack_params(params, SC_FEATURES, FC_FEATURES,
                         HIDDEN_DIM, NUM_LAYERS, NUM_CLASSES)

    sc_x = jax.random.normal(k_scx, (NUM_NODES, SC_FEATURES), jnp.float32)
    fc_x = jax.random.normal(k_fcx, (NUM_NODES, FC_FEATURES), jnp.float32)

    sc_edge_index = jax.random.randint(k_sce, (2, NUM_EDGES), 0, NUM_NODES, jnp.int32)
    fc_edge_index = jax.random.randint(k_fce, (2, NUM_EDGES), 0, NUM_NODES, jnp.int32)

    batch = jnp.concatenate([
        jnp.zeros((NUM_NODES // 2,), jnp.int32),
        jnp.ones((NUM_NODES - NUM_NODES // 2,), jnp.int32),
    ])

    sc_adj = build_mean_adjacency(sc_edge_index, NUM_NODES)
    fc_adj = build_mean_adjacency(fc_edge_index, NUM_NODES)
    pool_mat = build_pool_matrix(batch, NUM_GRAPHS)

    fwd = jax.jit(functools.partial(graphsage_forward, packed, NUM_LAYERS, NUM_CLASSES))
    out = fwd(sc_x, sc_adj, fc_x, fc_adj, pool_mat)
    jax.block_until_ready(out)

    assert out.shape == (NUM_GRAPHS, NUM_CLASSES)
    # log_softmax rows should sum (in prob space) to ~1
    assert jnp.allclose(jnp.sum(jnp.exp(out), axis=-1), 1.0, atol=1e-3)
    # loose check vs. f32 pure-JAX reference (kernels use bf16 MXU inputs)
    ref = reference_forward(params, sc_x, sc_adj, fc_x, fc_adj, pool_mat)
    assert jnp.allclose(out, ref, atol=1.5e-1), (out, ref)

    print("KERNEL_OK")
</pallas_src>

<mosaic_0001>
module attributes {stable_mosaic.version = 11 : i64} {
  func.func @_head_kernel(%arg0: memref<16x256xf32, #tpu.memory_space<vmem>>, %arg1: memref<256x128xf32, #tpu.memory_space<vmem>>, %arg2: memref<1x128xf32, #tpu.memory_space<vmem>>, %arg3: memref<128x128xf32, #tpu.memory_space<vmem>>, %arg4: memref<1x128xf32, #tpu.memory_space<vmem>>, %arg5: memref<128x128xf32, #tpu.memory_space<vmem>>, %arg6: memref<1x128xf32, #tpu.memory_space<vmem>>, %arg7: memref<16x128xf32, #tpu.memory_space<vmem>>) attributes {dimension_semantics = [], scalar_prefetch = 0 : i64, scratch_operands = 0 : i64, tpu.core_type = #tpu.core_type<tc>} {
    %c0 = arith.constant 0 : index
    %c0_0 = arith.constant 0 : index
    %0 = vector.load %arg0[%c0, %c0_0] : memref<16x256xf32, #tpu.memory_space<vmem>>, vector<16x256xf32>
    %c0_1 = arith.constant 0 : index
    %c0_2 = arith.constant 0 : index
    %1 = vector.load %arg1[%c0_1, %c0_2] : memref<256x128xf32, #tpu.memory_space<vmem>>, vector<256x128xf32>
    %cst = arith.constant dense<0.000000e+00> : vector<16x128xf32>
    %2 = tpu.matmul %0, %1, %cst {dimension_numbers = #tpu.dot_dimension_numbers<[1], [0], [0], [1], [0, 0, 1, 1], [], []>} : vector<16x256xf32>, vector<256x128xf32>, vector<16x128xf32> -> vector<16x128xf32>
    %c0_3 = arith.constant 0 : index
    %c0_4 = arith.constant 0 : index
    %3 = vector.load %arg2[%c0_3, %c0_4] : memref<1x128xf32, #tpu.memory_space<vmem>>, vector<1x128xf32>
    %4 = vector.broadcast %3 : vector<1x128xf32> to vector<16x128xf32>
    %5 = arith.addf %2, %4 : vector<16x128xf32>
    %cst_5 = arith.constant 0.000000e+00 : f32
    %6 = vector.broadcast %cst_5 : f32 to vector<16x128xf32>
    %7 = arith.maximumf %5, %6 : vector<16x128xf32>
    %c0_6 = arith.constant 0 : index
    %c0_7 = arith.constant 0 : index
    %8 = vector.load %arg3[%c0_6, %c0_7] : memref<128x128xf32, #tpu.memory_space<vmem>>, vector<128x128xf32>
    %cst_8 = arith.constant dense<0.000000e+00> : vector<16x128xf32>
    %9 = tpu.matmul %7, %8, %cst_8 {dimension_numbers = #tpu.dot_dimension_numbers<[1], [0], [0], [1], [0, 0, 1, 1], [], []>} : vector<16x128xf32>, vector<128x128xf32>, vector<16x128xf32> -> vector<16x128xf32>
    %c0_9 = arith.constant 0 : index
    %c0_10 = arith.constant 0 : index
    %10 = vector.load %arg4[%c0_9, %c0_10] : memref<1x128xf32, #tpu.memory_space<vmem>>, vector<1x128xf32>
    %11 = vector.broadcast %10 : vector<1x128xf32> to vector<16x128xf32>
    %12 = arith.addf %9, %11 : vector<16x128xf32>
    %cst_11 = arith.constant 0.000000e+00 : f32
    %13 = vector.broadcast %cst_11 : f32 to vector<16x128xf32>
    %14 = arith.maximumf %12, %13 : vector<16x128xf32>
    %c0_12 = arith.constant 0 : index
    %c0_13 = arith.constant 0 : index
    %15 = vector.load %arg5[%c0_12, %c0_13] : memref<128x128xf32, #tpu.memory_space<vmem>>, vector<128x128xf32>
    %cst_14 = arith.constant dense<0.000000e+00> : vector<16x128xf32>
    %16 = tpu.matmul %14, %15, %cst_14 {dimension_numbers = #tpu.dot_dimension_numbers<[1], [0], [0], [1], [0, 0, 1, 1], [], []>} : vector<16x128xf32>, vector<128x128xf32>, vector<16x128xf32> -> vector<16x128xf32>
    %c0_15 = arith.constant 0 : index
    %c0_16 = arith.constant 0 : index
    %17 = vector.load %arg6[%c0_15, %c0_16] : memref<1x128xf32, #tpu.memory_space<vmem>>, vector<1x128xf32>
    %18 = vector.broadcast %17 : vector<1x128xf32> to vector<16x128xf32>
    %19 = arith.addf %16, %18 : vector<16x128xf32>
    %20 = tpu.iota {dimensions = array<i32: 1>} : vector<16x128xi32>
    %c4_i32 = arith.constant 4 : i32
    %21 = vector.broadcast %c4_i32 : i32 to vector<16x128xi32>
    %22 = arith.cmpi slt, %20, %21 : vector<16x128xi32>
    %cst_17 = arith.constant -1.000000e+30 : f32
    %23 = vector.broadcast %cst_17 : f32 to vector<16x128xf32>
    %24 = arith.select %22, %19, %23 : vector<16x128xi1>, vector<16x128xf32>
    %cst_18 = arith.constant dense<0xFF800000> : vector<16xf32>
    %25 = vector.multi_reduction <maximumf>, %24, %cst_18 [1] : vector<16x128xf32> to vector<16xf32>
    %26 = vector.shape_cast %25 : vector<16xf32> to vector<16x1xf32>
    %27 = vector.broadcast %26 : vector<16x1xf32> to vector<16x128xf32>
    %28 = arith.subf %24, %27 : vector<16x128xf32>
    %29 = math.exp %28 : vector<16x128xf32>
    %cst_19 = arith.constant dense<0.000000e+00> : vector<16xf32>
    %30 = vector.multi_reduction <add>, %29, %cst_19 [1] : vector<16x128xf32> to vector<16xf32>
    %31 = vector.shape_cast %30 : vector<16xf32> to vector<16x1xf32>
    %32 = math.log %31 : vector<16x1xf32>
    %33 = vector.broadcast %32 : vector<16x1xf32> to vector<16x128xf32>
    %34 = arith.subf %28, %33 : vector<16x128xf32>
    %c0_20 = arith.constant 0 : index
    %c0_21 = arith.constant 0 : index
    %35 = vector.load %arg7[%c0_20, %c0_21] : memref<16x128xf32, #tpu.memory_space<vmem>>, vector<16x128xf32>
    tpu.vector_store %arg7[%c0_20, %c0_21], %34 {strides = array<i32>} : memref<16x128xf32, #tpu.memory_space<vmem>>, vector<16x128xf32>,
    return
  }
}

module attributes {stable_mosaic.version = 11 : i64} {
  func.func @_branch_kernel(%arg0: i32, %arg1: memref<1x16x16xbf16, #tpu.memory_space<vmem>>, %arg2: memref<1x16x128xbf16, #tpu.memory_space<vmem>>, %arg3: memref<1x256x128xbf16, #tpu.memory_space<vmem>>, %arg4: memref<1x1x128xf32, #tpu.memory_space<vmem>>, %arg5: memref<1x1x256x128xbf16, #tpu.memory_space<vmem>>, %arg6: memref<1x1x1x128xf32, #tpu.memory_space<vmem>>, %arg7: memref<16x16xbf16, #tpu.memory_space<vmem>>, %arg8: memref<16x128xf32, #tpu.memory_space<vmem>>) attributes {dimension_semantics = [#tpu.dimension_semantics<parallel>], iteration_bounds = array<i64: 2>, scalar_prefetch = 0 : i64, scratch_operands = 0 : i64, tpu.core_type = #tpu.core_type<tc>, window_params = [{transform_indices = @transform_0, window_bounds = array<i64: 1, 16, 16>}, {transform_indices = @transform_1, window_bounds = array<i64: 1, 16, 128>}, {transform_indices = @transform_2, window_bounds = array<i64: 1, 256, 128>}, {transform_indices = @transform_3, window_bounds = array<i64: 1, 1, 128>}, {transform_indices = @transform_4, window_bounds = array<i64: 1, 1, 256, 128>}, {transform_indices = @transform_5, window_bounds = array<i64: 1, 1, 1, 128>}, {pipeline_mode = #tpu.pipeline_mode<synchronous>, transform_indices = @transform_6, window_bounds = array<i64: 16, 16>}, {transform_indices = @transform_7, window_bounds = array<i64: 16, 128>}]} {
    %c0 = arith.constant 0 : index
    %c0_0 = arith.constant 0 : index
    %c0_1 = arith.constant 0 : index
    %0 = vector.load %arg1[%c0, %c0_0, %c0_1] : memref<1x16x16xbf16, #tpu.memory_space<vmem>>, vector<1x16x16xbf16>
    %1 = vector.shape_cast %0 : vector<1x16x16xbf16> to vector<16x16xbf16>
    %c0_2 = arith.constant 0 : index
    %c0_3 = arith.constant 0 : index
    %c0_4 = arith.constant 0 : index
    %2 = vector.load %arg2[%c0_2, %c0_3, %c0_4] : memref<1x16x128xbf16, #tpu.memory_space<vmem>>, vector<1x16x128xbf16>
    %3 = vector.shape_cast %2 : vector<1x16x128xbf16> to vector<16x128xbf16>
    %c0_5 = arith.constant 0 : index
    %c0_6 = arith.constant 0 : index
    %c0_7 = arith.constant 0 : index
    %4 = vector.load %arg3[%c0_5, %c0_6, %c0_7] : memref<1x256x128xbf16, #tpu.memory_space<vmem>>, vector<1x256x128xbf16>
    %5 = vector.shape_cast %4 : vector<1x256x128xbf16> to vector<256x128xbf16>
    %c0_8 = arith.constant 0 : index
    %c0_9 = arith.constant 0 : index
    %c0_10 = arith.constant 0 : index
    %6 = vector.load %arg4[%c0_8, %c0_9, %c0_10] : memref<1x1x128xf32, #tpu.memory_space<vmem>>, vector<1x1x128xf32>
    %7 = vector.shape_cast %6 : vector<1x1x128xf32> to vector<1x128xf32>
    %cst = arith.constant dense<0.000000e+00> : vector<16x128xf32>
    %8 = tpu.matmul %1, %3, %cst {dimension_numbers = #tpu.dot_dimension_numbers<[1], [0], [0], [1], [0, 0, 1, 1], [], []>} : vector<16x16xbf16>, vector<16x128xbf16>, vector<16x128xf32> -> vector<16x128xf32>
    %9 = arith.truncf %8 : vector<16x128xf32> to vector<16x128xbf16>
    %10 = tpu.concatenate %9, %3 in 1 : vector<16x128xbf16>, vector<16x128xbf16> -> vector<16x256xbf16>
    %cst_11 = arith.constant dense<0.000000e+00> : vector<16x128xf32>
    %11 = tpu.matmul %10, %5, %cst_11 {dimension_numbers = #tpu.dot_dimension_numbers<[1], [0], [0], [1], [0, 0, 1, 1], [], []>} : vector<16x256xbf16>, vector<256x128xbf16>, vector<16x128xf32> -> vector<16x128xf32>
    %12 = vector.broadcast %7 : vector<1x128xf32> to vector<16x128xf32>
    %13 = arith.addf %11, %12 : vector<16x128xf32>
    %cst_12 = arith.constant 0.000000e+00 : f32
    %14 = vector.broadcast %cst_12 : f32 to vector<16x128xf32>
    %15 = arith.maximumf %13, %14 : vector<16x128xf32>
    %16 = arith.truncf %15 : vector<16x128xf32> to vector<16x128xbf16>
    %c0_13 = arith.constant 0 : index
    %c0_14 = arith.constant 0 : index
    %c0_15 = arith.constant 0 : index
    %c0_16 = arith.constant 0 : index
    %17 = vector.load %arg5[%c0_13, %c0_14, %c0_15, %c0_16] : memref<1x1x256x128xbf16, #tpu.memory_space<vmem>>, vector<1x1x256x128xbf16>
    %18 = vector.shape_cast %17 : vector<1x1x256x128xbf16> to vector<256x128xbf16>
    %c0_17 = arith.constant 0 : index
    %c0_18 = arith.constant 0 : index
    %c0_19 = arith.constant 0 : index
    %c0_20 = arith.constant 0 : index
    %19 = vector.load %arg6[%c0_17, %c0_18, %c0_19, %c0_20] : memref<1x1x1x128xf32, #tpu.memory_space<vmem>>, vector<1x1x1x128xf32>
    %20 = vector.shape_cast %19 : vector<1x1x1x128xf32> to vector<1x128xf32>
    %cst_21 = arith.constant dense<0.000000e+00> : vector<16x128xf32>
    %21 = tpu.matmul %1, %16, %cst_21 {dimension_numbers = #tpu.dot_dimension_numbers<[1], [0], [0], [1], [0, 0, 1, 1], [], []>} : vector<16x16xbf16>, vector<16x128xbf16>, vector<16x128xf32> -> vector<16x128xf32>
    %22 = arith.truncf %21 : vector<16x128xf32> to vector<16x128xbf16>
    %23 = tpu.concatenate %22, %16 in 1 : vector<16x128xbf16>, vector<16x128xbf16> -> vector<16x256xbf16>
    %cst_22 = arith.constant dense<0.000000e+00> : vector<16x128xf32>
    %24 = tpu.matmul %23, %18, %cst_22 {dimension_numbers = #tpu.dot_dimension_numbers<[1], [0], [0], [1], [0, 0, 1, 1], [], []>} : vector<16x256xbf16>, vector<256x128xbf16>, vector<16x128xf32> -> vector<16x128xf32>
    %25 = vector.broadcast %20 : vector<1x128xf32> to vector<16x128xf32>
    %26 = arith.addf %24, %25 : vector<16x128xf32>
    %cst_23 = arith.constant 0.000000e+00 : f32
    %27 = vector.broadcast %cst_23 : f32 to vector<16x128xf32>
    %28 = arith.maximumf %26, %27 : vector<16x128xf32>
    %29 = arith.truncf %28 : vector<16x128xf32> to vector<16x128xbf16>
    %c0_24 = arith.constant 0 : index
    %c0_25 = arith.constant 0 : index
    %30 = vector.load %arg7[%c0_24, %c0_25] : memref<16x16xbf16, #tpu.memory_space<vmem>>, vector<16x16xbf16>
    %cst_26 = arith.constant dense<0.000000e+00> : vector<16x128xf32>
    %31 = tpu.matmul %30, %29, %cst_26 {dimension_numbers = #tpu.dot_dimension_numbers<[1], [0], [0], [1], [0, 0, 1, 1], [], []>} : vector<16x16xbf16>, vector<16x128xbf16>, vector<16x128xf32> -> vector<16x128xf32>
    %c0_27 = arith.constant 0 : index
    %c0_28 = arith.constant 0 : index
    %32 = vector.load %arg8[%c0_27, %c0_28] : memref<16x128xf32, #tpu.memory_space<vmem>>, vector<16x128xf32>
    tpu.vector_store %arg8[%c0_27, %c0_28], %31 {strides = array<i32>} : memref<16x128xf32, #tpu.memory_space<vmem>>, vector<16x128xf32>,
    return
  }
  func.func @transform_0(%arg0: i32) -> (i32, i32, i32) {
    %c0_i32 = arith.constant 0 : i32
    %c0_i32_0 = arith.constant 0 : i32
    %c0_i32_1 = arith.constant 0 : i32
    return %arg0, %c0_i32, %c0_i32_0 : i32, i32, i32
  }
  func.func @transform_1(%arg0: i32) -> (i32, i32, i32) {
    %c0_i32 = arith.constant 0 : i32
    %c0_i32_0 = arith.constant 0 : i32
    %c0_i32_1 = arith.constant 0 : i32
    return %arg0, %c0_i32, %c0_i32_0 : i32, i32, i32
  }
  func.func @transform_2(%arg0: i32) -> (i32, i32, i32) {
    %c0_i32 = arith.constant 0 : i32
    %c0_i32_0 = arith.constant 0 : i32
    %c0_i32_1 = arith.constant 0 : i32
    return %arg0, %c0_i32, %c0_i32_0 : i32, i32, i32
  }
  func.func @transform_3(%arg0: i32) -> (i32, i32, i32) {
    %c0_i32 = arith.constant 0 : i32
    %c0_i32_0 = arith.constant 0 : i32
    %c0_i32_1 = arith.constant 0 : i32
    return %arg0, %c0_i32, %c0_i32_0 : i32, i32, i32
  }
  func.func @transform_4(%arg0: i32) -> (i32, i32, i32, i32) {
    %c0_i32 = arith.constant 0 : i32
    %c0_i32_0 = arith.constant 0 : i32
    %c0_i32_1 = arith.constant 0 : i32
    %c0_i32_2 = arith.constant 0 : i32
    return %arg0, %c0_i32, %c0_i32_0, %c0_i32_1 : i32, i32, i32, i32
  }
  func.func @transform_5(%arg0: i32) -> (i32, i32, i32, i32) {
    %c0_i32 = arith.constant 0 : i32
    %c0_i32_0 = arith.constant 0 : i32
    %c0_i32_1 = arith.constant 0 : i32
    %c0_i32_2 = arith.constant 0 : i32
    return %arg0, %c0_i32, %c0_i32_0, %c0_i32_1 : i32, i32, i32, i32
  }
  func.func @transform_6(%arg0: i32) -> (i32, i32) {
    %c0_i32 = arith.constant 0 : i32
    %c0_i32_0 = arith.constant 0 : i32
    %c0_i32_1 = arith.constant 0 : i32
    return %c0_i32, %c0_i32_0 : i32, i32
  }
  func.func @transform_7(%arg0: i32) -> (i32, i32) {
    %c0_i32 = arith.constant 0 : i32
    %c0_i32_0 = arith.constant 0 : i32
    return %c0_i32, %arg0 : i32, i32
  }
}

</mosaic_0001>

<bundles_post_ra>
// kernel: graphsage_forward.3
= control target key start
LH: loop header
LB: loop body
LE: loop exit
PB: predicated region body
PF: predicated region fallthrough
CT: control target
= control target key end

     0   :  { %s789_s1 = inlined_call_operand.vmem [shape: f32[256,128], index: 1, kind: input, shape index: {}]   ;;  %s790_s0 = inlined_call_operand.vmem [shape: f32[16,256], index: 0, kind: input, shape index: {}]   ;;  %s791_s3 = inlined_call_operand.vmem [shape: f32[128,128], index: 3, kind: input, shape index: {}]   ;;  %s792_s5 = inlined_call_operand.vmem [shape: f32[128,128], index: 5, kind: input, shape index: {}]   ;;  %s793_s2 = inlined_call_operand.vmem [shape: f32[1,128], index: 2, kind: input, shape index: {}, may-alias: {2,4,6}]   ;;  %s794_s4 = inlined_call_operand.vmem [shape: f32[1,128], index: 4, kind: input, shape index: {}, may-alias: {2,4,6}]   ;;  %s795_s6 = inlined_call_operand.vmem [shape: f32[1,128], index: 6, kind: input, shape index: {}, may-alias: {2,4,6}]   ;;  %s796_s7 = inlined_call_operand.vmem [shape: f32[16,128], index: 7, kind: output, shape index: {}]  }
   0x1   :  { %v61_v0 = vld [vmem:[%s789_s1 + $0xf8] sm:$0xff]  ;;  %v60_v2 = vld [vmem:[%s789_s1 + $0xf0] sm:$0xff]  ;;  %v59_v4 = vld [vmem:[%s789_s1 + $0xe8] sm:$0xff] }
   0x2   :  { %v45_v1 = vld [vmem:[%s789_s1 + $0x78] sm:$0xff]  ;;  %378 = vmatprep.subr.mxu0 %v61_v0  ;;  %v44_v3 = vld [vmem:[%s789_s1 + $0x70] sm:$0xff]  ;;  %v43_v5 = vld [vmem:[%s789_s1 + $0x68] sm:$0xff] }
   0x3   :  { %379 = vmatpush3.msra.mxu0 %v45_v1  ;;  %v58_v6 = vld [vmem:[%s789_s1 + $0xe0] sm:$0xff]  ;;  %v57_v8 = vld [vmem:[%s789_s1 + $0xd8] sm:$0xff]  ;;  %v56_v10 = vld [vmem:[%s789_s1 + $0xd0] sm:$0xff] }
   0x4   :  { %380 = vmatprep.subr.mxu0 %v60_v2  ;;  %v42_v7 = vld [vmem:[%s789_s1 + $0x60] sm:$0xff]  ;;  %v41_v9 = vld [vmem:[%s789_s1 + $0x58] sm:$0xff]  ;;  %v40_v11 = vld [vmem:[%s789_s1 + $0x50] sm:$0xff] }
   0x5   :  { %381 = vmatpush3.msra.mxu0 %v44_v3  ;;  %v55_v12 = vld [vmem:[%s789_s1 + $0xc8] sm:$0xff]  ;;  %v54_v15 = vld [vmem:[%s789_s1 + $0xc0] sm:$0xff]  ;;  %v161_v16 = vld [vmem:[%s791_s3 + $0x78] sm:$0xff] }
   0x6   :  { %382 = vmatprep.subr.mxu0 %v59_v4  ;;  %v27_v13 = vld [vmem:[%s790_s0 + $0x8] sm:$0xff]  ;;  %v160_v17 = vld [vmem:[%s791_s3 + $0x70] sm:$0xff]  ;;  %v38_v18 = vld [vmem:[%s789_s1 + $0x40] sm:$0xff]  ;;  %452 = vmatprep.subr.mxu1 %v161_v16 }
   0x7   :  { %383 = vmatpush3.msra.mxu0 %v43_v5  ;;  %v39_v14 = vld [vmem:[%s789_s1 + $0x48] sm:$0xff]  ;;  %133 = vmatprep.mubr.f32.mxu0 %v27_v13  ;;  %v53_v19 = vld [vmem:[%s789_s1 + $0xb8] sm:$0xff]  ;;  %v52_v22 = vld [vmem:[%s789_s1 + $0xb0] sm:$0xff] }
   0x8   :  { %384 = vmatprep.subr.mxu0 %v58_v6  ;;  %453 = vmatpush3.msra.mxu1 %v161_v16  ;;  %v159_v20 = vld [vmem:[%s791_s3 + $0x68] sm:$0xff]  ;;  %v37_v21 = vld [vmem:[%s789_s1 + $0x38] sm:$0xff]  ;;  %v158_v23 = vld [vmem:[%s791_s3 + $0x60] sm:$0xff] }
   0x9   :  { %385 = vmatpush3.msra.mxu0 %v42_v7  ;;  %454 = vmatprep.subr.mxu1 %v160_v17  ;;  %v36_v24 = vld [vmem:[%s789_s1 + $0x30] sm:$0xff]  ;;  %v51_v25 = vld [vmem:[%s789_s1 + $0xa8] sm:$0xff]  ;;  %v157_v26 = vld [vmem:[%s791_s3 + $0x58] sm:$0xff] }
   0xa   :  { %386 = vmatprep.subr.mxu0 %v57_v8  ;;  %455 = vmatpush3.msra.mxu1 %v160_v17  ;;  %v35_v27 = vld [vmem:[%s789_s1 + $0x28] sm:$0xff]  ;;  %v50_v28 = vld [vmem:[%s789_s1 + $0xa0] sm:$0xff]  ;;  %v156_v29 = vld [vmem:[%s791_s3 + $0x50] sm:$0xff] }
   0xb   :  { %387 = vmatpush3.msra.mxu0 %v41_v9  ;;  %456 = vmatprep.subr.mxu1 %v159_v20  ;;  %v34_v30 = vld [vmem:[%s789_s1 + $0x20] sm:$0xff]  ;;  %v49_v31 = vld [vmem:[%s789_s1 + $0x98] sm:$0xff]  ;;  %v155_v32 = vld [vmem:[%s791_s3 + $0x48] sm:$0xff] }
   0xc   :  { %388 = vmatprep.subr.mxu0 %v56_v10  ;;  %457 = vmatpush3.msra.mxu1 %v159_v20  ;;  %v33_v33 = vld [vmem:[%s789_s1 + $0x18] sm:$0xff]  ;;  %v48_v34 = vld [vmem:[%s789_s1 + $0x90] sm:$0xff]  ;;  %v154_v35 = vld [vmem:[%s791_s3 + $0x40] sm:$0xff] }
   0xd   :  { %389 = vmatpush3.msra.mxu0 %v40_v11  ;;  %458 = vmatprep.subr.mxu1 %v158_v23  ;;  %v32_v36 = vld [vmem:[%s789_s1 + $0x10] sm:$0xff]  ;;  %v47_v37 = vld [vmem:[%s789_s1 + $0x88] sm:$0xff]  ;;  %v153_v38 = vld [vmem:[%s791_s3 + $0x38] sm:$0xff] }
   0xe   :  { %390 = vmatprep.subr.mxu0 %v55_v12  ;;  %459 = vmatpush3.msra.mxu1 %v158_v23  ;;  %v31_v39 = vld [vmem:[%s789_s1 + $0x8] sm:$0xff]  ;;  %v46_v40 = vld [vmem:[%s789_s1 + $0x80] sm:$0xff]  ;;  %v152_v41 = vld [vmem:[%s791_s3 + $0x30] sm:$0xff] }
   0xf   :  { %391 = vmatpush3.msra.mxu0 %v39_v14  ;;  %460 = vmatprep.subr.mxu1 %v157_v26  ;;  %v30_v42 = vld [vmem:[%s789_s1] sm:$0xff]  ;;  %v29_v44 = vld [vmem:[%s790_s0 + $0x18] sm:$0xff]  ;;  %v28_v45 = vld [vmem:[%s790_s0 + $0x10] sm:$0xff] }
  0x10   :  { %392 = vmatprep.subr.mxu0 %v54_v15  ;;  %461 = vmatpush3.msra.mxu1 %v157_v26  ;;  %v26_v43 = vld [vmem:[%s790_s0] sm:$0xff]  ;;  %v151_v46 = vld [vmem:[%s791_s3 + $0x28] sm:$0xff]  ;;  %v149_v48 = vld [vmem:[%s791_s3 + $0x18] sm:$0xff] }
  0x11   :  { %393 = vmatpush3.msra.mxu0 %v38_v18  ;;  %462 = vmatprep.subr.mxu1 %v156_v29  ;;  %v150_v47 = vld [vmem:[%s791_s3 + $0x20] sm:$0xff]  ;;  %v148_v49 = vld [vmem:[%s791_s3 + $0x10] sm:$0xff]  ;;  %v147_v50 = vld [vmem:[%s791_s3 + $0x8] sm:$0xff] }
  0x12   :  { %394 = vmatprep.subr.mxu0 %v53_v19  ;;  %463 = vmatpush3.msra.mxu1 %v156_v29  ;;  %v146_v51 = vld [vmem:[%s791_s3] sm:$0xff]  ;;  %v261_v52 = vld [vmem:[%s792_s5 + $0x78] sm:$0xff]  ;;  %v260_v53 = vld [vmem:[%s792_s5 + $0x70] sm:$0xff] }
  0x13   :  { %395 = vmatpush3.msra.mxu0 %v37_v21  ;;  %464 = vmatprep.subr.mxu1 %v155_v32  ;;  %v259_v54 = vld [vmem:[%s792_s5 + $0x68] sm:$0xff]  ;;  %v258_v55 = vld [vmem:[%s792_s5 + $0x60] sm:$0xff]  ;;  %v257_v56 = vld [vmem:[%s792_s5 + $0x58] sm:$0xff] }
  0x14   :  { %396 = vmatprep.subr.mxu0 %v52_v22  ;;  %465 = vmatpush3.msra.mxu1 %v155_v32  ;;  %v256_v57 = vld [vmem:[%s792_s5 + $0x50] sm:$0xff]  ;;  %v255_v58 = vld [vmem:[%s792_s5 + $0x48] sm:$0xff]  ;;  %v254_v59 = vld [vmem:[%s792_s5 + $0x40] sm:$0xff]  ;;  %v344_v22 = vlaneseq }
  0x15   :  { %397 = vmatpush3.msra.mxu0 %v36_v24  ;;  %466 = vmatprep.subr.mxu1 %v154_v35  ;;  %v253_v60 = vld [vmem:[%s792_s5 + $0x38] sm:$0xff]  ;;  %v252_v61 = vld [vmem:[%s792_s5 + $0x30] sm:$0xff]  ;;  %v251_v62 = vld [vmem:[%s792_s5 + $0x28] sm:$0xff] }
  0x16   :  { %398 = vmatprep.subr.mxu0 %v51_v25  ;;  %467 = vmatpush3.msra.mxu1 %v154_v35  ;;  %v250_v63 = vld [vmem:[%s792_s5 + $0x20] sm:$0xff]  ;;  %v249_v11 = vld [vmem:[%s792_s5 + $0x18] sm:$0xff]  ;;  %v248_v12 = vld [vmem:[%s792_s5 + $0x10] sm:$0xff]  ;;  %v345_v24 = vand.u32 127, %v344_v22 }
  0x17   :  { %399 = vmatpush3.msra.mxu0 %v35_v27  ;;  %468 = vmatprep.subr.mxu1 %v153_v38  ;;  %v375_v2 = vld [vmem:[%s793_s2] ss:$0 sm:$0xff]  ;;  %v247_v13 = vld [vmem:[%s792_s5 + $0x8] sm:$0xff] }
  0x18   :  { %400 = vmatprep.subr.mxu0 %v50_v28  ;;  %469 = vmatpush3.msra.mxu1 %v153_v38  ;;  %v246_v14 = vld [vmem:[%s792_s5] sm:$0xff]  ;;  %vm346_vm0 = vcmp.lt.s32.totalorder %v345_v24, 4 }
  0x19   :  { %401 = vmatpush3.msra.mxu0 %v34_v30  ;;  %470 = vmatprep.subr.mxu1 %v152_v41  ;;  %v376_v15 = vld [vmem:[%s794_s4] ss:$0 sm:$0xff] }
  0x1a   :  { %402 = vmatprep.subr.mxu0 %v49_v31  ;;  %471 = vmatpush3.msra.mxu1 %v152_v41  ;;  %v377_v25 = vld [vmem:[%s795_s6] ss:$0 sm:$0xff] }
  0x1b   :  { %403 = vmatpush3.msra.mxu0 %v33_v33  ;;  %472 = vmatprep.subr.mxu1 %v151_v46 }
  0x1c   :  { %404 = vmatprep.subr.mxu0 %v48_v34  ;;  %473 = vmatpush3.msra.mxu1 %v151_v46 }
  0x1d   :  { %405 = vmatpush3.msra.mxu0 %v32_v36  ;;  %474 = vmatprep.subr.mxu1 %v150_v47 }
  0x1e   :  { %406 = vmatprep.subr.mxu0 %v47_v37  ;;  %475 = vmatpush3.msra.mxu1 %v150_v47 }
  0x1f   :  { %407 = vmatpush3.msra.mxu0 %v31_v39  ;;  %476 = vmatprep.subr.mxu1 %v149_v48 }
  0x20   :  { %408 = vmatprep.subr.mxu0 %v46_v40  ;;  %477 = vmatpush3.msra.mxu1 %v149_v48 }
  0x21   :  { %409 = vmatpush3.msra.mxu0 %v30_v42  ;;  %478 = vmatprep.subr.mxu1 %v148_v49 }
  0x22   :  { %134 = vmatmul.mubr.f32.vlgmr.msra.gmra.mxu0 %v26_v43  ;;  %479 = vmatpush3.msra.mxu1 %v148_v49 }
  0x23   :  { %138 = vmatprep.mubr.f32.mxu0 %v29_v44  ;;  %480 = vmatprep.subr.mxu1 %v147_v50 }
  0x24   :  { %481 = vmatpush3.msra.mxu1 %v147_v50  ;;  %487 = vmatprep.subr.mxu0 %v261_v52 }
  0x25   :  { %482 = vmatprep.subr.mxu1 %v146_v51  ;;  %488 = vmatpush3.msra.mxu0 %v261_v52 }
  0x26   :  { %139 = vmatmul.mubr.f32.gmra.mxu0 %v28_v45  ;;  %483 = vmatpush3.msra.mxu1 %v146_v51 }
  0x27   :  { %489 = vmatprep.subr.mxu0 %v260_v53 }
  0x28   :  { %490 = vmatpush3.msra.mxu0 %v260_v53 }
  0x29   :  { %491 = vmatprep.subr.mxu0 %v259_v54 }
  0x2a   :  { %492 = vmatpush3.msra.mxu0 %v259_v54 }
  0x2b   :  { %493 = vmatprep.subr.mxu0 %v258_v55 }
  0x2c   :  { %494 = vmatpush3.msra.mxu0 %v258_v55 }
  0x2d   :  { %495 = vmatprep.subr.mxu0 %v257_v56 }
  0x2e   :  { %496 = vmatpush3.msra.mxu0 %v257_v56 }
  0x2f   :  { %497 = vmatprep.subr.mxu0 %v256_v57 }
  0x30   :  { %498 = vmatpush3.msra.mxu0 %v256_v57 }
  0x31   :  { %499 = vmatprep.subr.mxu0 %v255_v58 }
  0x32   :  { %500 = vmatpush3.msra.mxu0 %v255_v58 }
  0x33   :  { %501 = vmatprep.subr.mxu0 %v254_v59 }
  0x34   :  { %502 = vmatpush3.msra.mxu0 %v254_v59 }
  0x35   :  { %503 = vmatprep.subr.mxu0 %v253_v60 }
  0x36   :  { %504 = vmatpush3.msra.mxu0 %v253_v60 }
  0x37   :  { %505 = vmatprep.subr.mxu0 %v252_v61 }
  0x38   :  { %506 = vmatpush3.msra.mxu0 %v252_v61 }
  0x39   :  { %507 = vmatprep.subr.mxu0 %v251_v62 }
  0x3a   :  { %508 = vmatpush3.msra.mxu0 %v251_v62 }
  0x3b   :  { %509 = vmatprep.subr.mxu0 %v250_v63 }
  0x3c   :  { %510 = vmatpush3.msra.mxu0 %v250_v63 }
  0x3d   :  { %511 = vmatprep.subr.mxu0 %v249_v11 }
  0x3e   :  { %512 = vmatpush3.msra.mxu0 %v249_v11 }
  0x3f   :  { %513 = vmatprep.subr.mxu0 %v248_v12 }
  0x40   :  { %514 = vmatpush3.msra.mxu0 %v248_v12 }
  0x41   :  { %515 = vmatprep.subr.mxu0 %v247_v13 }
  0x42   :  { %516 = vmatpush3.msra.mxu0 %v247_v13 }
  0x43   :  { %517 = vmatprep.subr.mxu0 %v246_v14 }
  0x44   :  { %518 = vmatpush3.msra.mxu0 %v246_v14 }
  0xe2   :  { %v410_v0 = vpop.f32.mrf.mxu0 }
  0xe4   :  { %v411_v1 = vpop.f32.mrf.mxu0 }
  0xe5   :  { %v412_v3 = vadd.f32 %v411_v1, %v410_v0 }
  0xe6   :  { %v413_v4 = vpop.f32.mrf.mxu0 }
  0xe7   :  { %v136_v5 = vadd.f32 %v412_v3, %v375_v2 }
  0xe8   :  { %v414_v6 = vpop.f32.mrf.mxu0 }
  0xe9   :  { %v415_v7 = vadd.f32 %v414_v6, %v413_v4  ;;  %v144_v8 = vmax.f32 %v136_v5, 0.0 }
  0xeb   :  { %v141_v9 = vadd.f32 %v415_v7, %v375_v2  ;;  %484 = vmatprep.mubr.f32.mxu1 %v144_v8 }
  0xed   :  { %v145_v10 = vmax.f32 %v141_v9, 0.0 }
  0xef   :  { %485 = vmatmul.mubr.f32.vlgmr.msra.gmra.mxu1 %v145_v10 }
 0x1af   :  { %v486_v16 = vpop.f32.mrf.mxu1 }
 0x1b0   :  { %v241_v17 = vadd.f32 %v486_v16, %v376_v15 }
 0x1b1   :  { %v235_v18 = vpop.f32.mrf.mxu1 }
 0x1b2   :  { %v236_v19 = vadd.f32 %v376_v15, %v235_v18  ;;  %v245_v21 = vmax.f32 %v241_v17, 0.0 }
 0x1b4   :  { %v244_v20 = vmax.f32 %v236_v19, 0.0 }
 0x1b6   :  { %519 = vmatprep.mubr.f32.mxu0 %v244_v20 }
 0x1b7   :  { %520 = vmatmul.mubr.f32.vlgmr.msra.gmra.mxu0 %v245_v21 }
 0x277   :  { %v521_v23 = vpop.f32.mrf.mxu0 }
 0x278   :  { %v341_v28 = vadd.f32 %v521_v23, %v377_v25 }
 0x279   :  { %v335_v26 = vpop.f32.mrf.mxu0 }
 0x27a   :  { %v336_v27 = vadd.f32 %v377_v25, %v335_v26  ;;  %v348_v30 = vsel %vm346_vm0, %v341_v28, -1e+30 }
 0x27c   :  { %v347_v29 = vsel %vm346_vm0, %v336_v27, -1e+30 }
 0x27d   :  { %349 = vmax.xlane.f32.xlu0 %v347_v29 }
 0x281   :  { %351 = vmax.xlane.f32.xlu0 %v348_v30 }
 0x306   :  { %v350_v31 = vpop.xlane.xlu0 %349 }
 0x307   :  { %v353_v32 = vsub.f32 %v347_v29, %v350_v31 }
 0x309   :  { %v355_v33 = vmul.f32 1.442695, %v353_v32 }
 0x30a   :  { %v352_v34 = vpop.xlane.xlu0 %351 }
 0x30b   :  { %v354_v35 = vsub.f32 %v348_v30, %v352_v34  ;;  %522 = vpow2.f32 %v355_v33 }
 0x30d   :  { %v357_v36 = vmul.f32 1.442695, %v354_v35 }
 0x30f   :  { %524 = vpow2.f32 %v357_v36 }
 0x318   :  { %v523_v37 = vpop.eup %522 }
 0x319   :  { %359 = vadd.xlane.f32.xlu1 %v523_v37 }
 0x31c   :  { %v525_v38 = vpop.eup %524 }
 0x31d   :  { %361 = vadd.xlane.f32.xlu1 %v525_v38 }
 0x3a2   :  { %v360_v39 = vpop.xlane.xlu1 %359 }
 0x3a3   :  { %526 = vlog2.f32 %v360_v39 }
 0x3a6   :  { %v362_v40 = vpop.xlane.xlu1 %361 }
 0x3a7   :  { %528 = vlog2.f32 %v362_v40 }
 0x3b0   :  { %v527_v41 = vpop.eup %526 }
 0x3b1   :  { %v364_v42 = vmul.f32 0.6931472, %v527_v41 }
 0x3b3   :  { %v367_v43 = vsub.f32 %v353_v32, %v364_v42 }
 0x3b4   :  { %v529_v44 = vpop.eup %528 }
 0x3b5   :  { %369 = vst [vmem:[%s796_s7] sm:$0xff] %v367_v43  ;;  %v366_v45 = vmul.f32 0.6931472, %v529_v44 }
 0x3b7   :  { %v368_v46 = vsub.f32 %v354_v35, %v366_v45 }
 0x3b9   :  { %370 = vst [vmem:[%s796_s7 + $0x8] sm:$0xff] %v368_v46 }

// kernel: graphsage_forward.2
= control target key start
LH: loop header
LB: loop body
LE: loop exit
PB: predicated region body
PF: predicated region fallthrough
CT: control target
= control target key end

     0   :  { %12 = vsyncpa [#allocation3], 0  ;;  %s1697_s0 = inlined_call_operand.vmem [shape: bf16[2,16,16], index: 0, kind: input, shape index: {}]   ;;  %s1698_s1 = inlined_call_operand.vmem [shape: bf16[2,16,128], index: 1, kind: input, shape index: {}]   ;;  %s1699_s2 = inlined_call_operand.hbm [shape: bf16[2,256,128], index: 2, kind: input, shape index: {}]   ;;  %s1700_s3 = inlined_call_operand.vmem [shape: f32[2,1,128], index: 3, kind: input, shape index: {}]   ;;  %s1701_s4 = inlined_call_operand.hbm [shape: bf16[2,1,256,128], index: 4, kind: input, shape index: {}]   ;;  %s1702_s5 = inlined_call_operand.vmem [shape: f32[2,1,1,128], index: 5, kind: input, shape index: {}]   ;;  %s1703_s6 = inlined_call_operand.vmem [shape: bf16[16,16], index: 6, kind: input, shape index: {}]   ;;  %s1704_s7 = inlined_call_operand.vmem [shape: f32[16,256], index: 7, kind: output, shape index: {}]  }
   0x1   :  { %14 = vsyncpa [#allocation3 + $0x1], 0 }
   0x2   :  { %15 = vsyncpa [#allocation5], 0 }
   0x3   :  { %17 = vsyncpa [#allocation5 + $0x1], 0  ;;  %s1447_s24 = smov 0   ;;  %s1449_s25 = smov 0  }
   0x4   :  { %s1451_s26 = smov 0   ;;  %s1453_s27 = smov 0  }
   0x5 LB: > { %s1466_s28 = sadd.s32 4294967295, %s1399_s27   ;;  %s1469_s29 = sadd.s32 1, %s1399_s27   ;;  %s1399_s27 = sphi %s1453_s27, %s1717_s27   ;;  %s1395_s26 = sphi %s1451_s26, %s1716_s26   ;;  %s1391_s25 = sphi %s1449_s25, %s1715_s25   ;;  %s1387_s24 = sphi %s1447_s24, %s1714_s24  }
   0x6   : > { %s79_s30 = ssub.s32 %s1399_s27, %s1469_s29  ;;  %s82_s8 = sadd.s32 1, %s1395_s26 }
   0x7   : > { %p80_p0 = scmp.eq.s32.totalorder %s79_s30, 0  ;;  %p89_p1 = scmp.ne.s32.totalorder %s1395_s26, %s1391_s25 }
   0x8   : > { %p90_p2 = scmp.eq.s32.totalorder %s1399_s27, 0  ;;  %p95_p3 = scmp.ne.s32.totalorder %s1391_s25, %s1387_s24 }
   0x9   : > { %s1479_s9 = scalar_select %p80_p0, %s1395_s26, %s82_s8  }
   0xa   : > { %p1481_p4 = por %p90_p2, %p89_p1  ;;  %p96_p5 = scmp.eq.s32.totalorder %s1466_s28, 0 }
   0xb   : > { %p218_p6 = scmp.eq.s32.totalorder %s1466_s28, 1  ;;  %p1233_p8 = scmp.lt.s32.totalorder %s1399_s27, 2 }
   0xc   : > { %p1487_p7 = por %p96_p5, %p95_p3  ;;  %s1497_s13 = sand.u32 1, %s1395_s26  }
   0xd   : > { %p1492_p9 = por %p218_p6, %p89_p1  ;;  %s1092_s14 = sshll.u32 %s1497_s13, 7 }
   0xe   : > { %s1707_s11 = scalar_select %p1487_p7, 1, 0 }
   0xf   : > { %s1708_s12 = scalar_select %p1492_p9, 1, 0 }
  0x10   : > { %s1150_s15 = sshll.u32 %s1399_s27, 11  ;;  %s267_s19 = scalar_lea.vmem [#allocation2], %s1092_s14 }
  0x11   : > { %s1506_s18 = scalar_lea.hbm %s1699_s2, %s1150_s15  ;;  %s274_s20 = sshll.u32 %s267_s19, 4  ;;  %s1510_s20 = int_to_ptr.vmem [resolvable:$true] %s274_s20 }
  0x12   : > { %p1514_p10 = pnand %p1233_p8, %p1481_p4  ;;  %s264_s22 = scalar_lea.sflag [#allocation3], %s1497_s13 }
  0x13   : > { %s1305_s23 = scalar_lea.hbm %s1506_s18, 2048  ;;  %s1310_s8 = scalar_lea.hbm %s1699_s2, 4096 }
  0x14   : > { %p1306_p12 = scmp.ne.s32.totalorder %s1506_s18, %s1305_s23  ;;  %p1307_p13 = pneg %p1514_p10 }
  0x15   : > { %p1311_p2 = scmp.lt.s32.totalorder %s1506_s18, %s1699_s2  ;;  %p1312_p3 = scmp.lt.s32.totalorder %s1310_s8, %s1305_s23 }
  0x16   : > { %p1308_p0 = pnand %p1307_p13, %p1306_p12 }
  0x17   : > { %p1313_p4 = por %p1312_p3, %p1311_p2 }
  0x18   : > { %p1309_p1 = pneg %p1308_p0 }
  0x1a   : > { %p1314_p5 = pnand %p1313_p4, %p1309_p1 }
  0x1c   : > { %1317 = shalt.err (!%p1314_p5)
}
  0x1d   : > { %s1318_s17 = scalar_lea.vmem %s1510_s20, 2048  ;;  %s1401_s19 = smov [#allocation2]  }
  0x1e   : > { %p1319_p6 = scmp.ne.s32.totalorder %s1510_s20, %s1318_s17  ;;  %s1323_s24 = sshll.u32 %s1401_s19, 4  ;;  %s1324_s24 = int_to_ptr.vmem [resolvable:$false] %s1323_s24 }
  0x1f   : > { %s1325_s30 = scalar_lea.vmem %s1324_s24, 4096  ;;  %p1326_p0 = scmp.lt.s32.totalorder %s1510_s20, %s1324_s24 }
  0x20   : > { %p1321_p8 = pnand %p1319_p6, %p1307_p13  ;;  %p1327_p11 = scmp.lt.s32.totalorder %s1325_s30, %s1318_s17 }
  0x22   : > { %p1322_p12 = pneg %p1321_p8  ;;  %p1328_p9 = por %p1327_p11, %p1326_p0 }
  0x24   : > { %p1329_p2 = pnand %p1328_p9, %p1322_p12 }
  0x26   : > { %1332 = shalt.err (!%p1329_p2)
}
  0x27   : > { %s1402_s23 = smov 64   ;;  %s1403_s8 = smov 4  }
  0x28   : > { %1229 = dma.hbm_to_vmem [thread:$0]  (!%p1514_p10), %s1506_s18, 2048, %s1510_s20, %s264_s22, %s1402_s23, %s1402_s23, %s1403_s8  }
  0x29   : > { %p315_p9 = scmp.lt.s32.totalorder %s1399_s27, 3  ;;  %s1555_s17 = scalar_lea.hbm %s1701_s4, %s1150_s15 }
  0x2a   : > { %p1710_p11 = scmp.ge.s32.totalorder %s1399_s27, 1  ;;  %s294_s24 = scalar_lea.vmem [#allocation4], %s1092_s14 }
  0x2b   : > { %s301_s30 = sshll.u32 %s294_s24, 4  ;;  %s291_s18 = scalar_lea.sflag [#allocation5], %s1497_s13  ;;  %s1565_s30 = int_to_ptr.vmem [resolvable:$true] %s301_s30 }
  0x2c   : > { %p1559_p1 = pnand %p1710_p11, %p315_p9  ;;  %s1333_s20 = scalar_lea.hbm %s1555_s17, 2048 }
  0x2d   : > { %p1334_p3 = scmp.ne.s32.totalorder %s1555_s17, %s1333_s20  ;;  %s1338_s22 = scalar_lea.hbm %s1701_s4, 4096 }
  0x2e   : > { %p1339_p6 = scmp.lt.s32.totalorder %s1555_s17, %s1701_s4  ;;  %p1340_p8 = scmp.lt.s32.totalorder %s1338_s22, %s1333_s20 }
  0x2f   : > { %p1336_p4 = pnand %p1334_p3, %p1307_p13 }
  0x30   : > { %p1341_p12 = por %p1340_p8, %p1339_p6 }
  0x31   : > { %p1337_p5 = pneg %p1336_p4 }
  0x33   : > { %p1342_p0 = pnand %p1341_p12, %p1337_p5 }
  0x35   : > { %1345 = shalt.err (!%p1342_p0)
}
  0x36   : > { %s1346_s13 = scalar_lea.vmem %s1565_s30, 2048  ;;  %s1404_s14 = smov [#allocation4]  }
  0x37   : > { %p1347_p2 = scmp.ne.s32.totalorder %s1565_s30, %s1346_s13  ;;  %s1351_s24 = sshll.u32 %s1404_s14, 4  ;;  %s1352_s24 = int_to_ptr.vmem [resolvable:$false] %s1351_s24 }
  0x38   : > { %s1353_s27 = scalar_lea.vmem %s1352_s24, 4096  ;;  %p1354_p3 = scmp.lt.s32.totalorder %s1565_s30, %s1352_s24 }
  0x39   : > { %p1349_p9 = pnand %p1347_p2, %p1307_p13  ;;  %p1355_p4 = scmp.lt.s32.totalorder %s1353_s27, %s1346_s13 }
  0x3b   : > { %p1350_p11 = pneg %p1349_p9  ;;  %p1356_p7 = por %p1355_p4, %p1354_p3 }
  0x3d   : > { %p1357_p6 = pnand %p1356_p7, %p1350_p11 }
  0x3f   : > { %1360 = shalt.err (!%p1357_p6)
}
  0x40   : > { %1232 = dma.hbm_to_vmem [thread:$0]  (!%p1514_p10), %s1555_s17, 2048, %s1565_s30, %s291_s18, %s1402_s23, %s1402_s23, %s1403_s8  }
  0x41   : > { %319 = sbr.rel (%p1559_p1) target bundleno = 1107 (0x453), region = 48  ;;  %s1596_s20 = sand.u32 (!%p1559_p1), 1, %s1391_s25  }
  0x42   : > { %s1099_s15 = sshll.u32 (!%p1559_p1), %s1596_s20, 7  ;;  %s322_s22 = scalar_lea.sflag (!%p1559_p1), [#allocation3], %s1596_s20 }
  0x43   : > { %s1600_s10 = scalar_lea.vmem (!%p1559_p1), [#allocation2], %s1099_s15  ;;  %p1712_p7 = scmp.ne.s32.totalorder (!%p1559_p1), %s1707_s11, 0 }
  0x46   : > { %1378 = dma.done.wait (%p1712_p7), %s322_s22, 2048  }
  0x47   : > { %1380 = vsyncadd (%p1712_p7), %s322_s22, 4294965248  ;;  %s331_s21 = scalar_lea.sflag [#allocation5], %s1596_s20  ;;  %s1607_s23 = scalar_lea.vmem [#allocation4], %s1099_s15 }
  0x48   : > { %1382 = dma.done.wait (%p1712_p7), %s331_s21, 2048  }
  0x49   : > { %1384 = vsyncadd (%p1712_p7), %s331_s21, 4294965248  ;;  %p385_p10 = scmp.lt.s32.totalorder %s1466_s28, 1  ;;  %v1405_v0 = vmov 0.0   ;;  %vm1406_vm0 = vmmov 0   ;;  %v1272_v3 = vld [vmem:[%s1600_s10 + $0x78] sm:$0xff]   ;;  %vm450_vm1 = vcmask 130048  }
  0x4a   : > { %1204 = vmatprep.subr.bf16.mxu0 %v1405_v0  ;;  %1206 = vmatprep.mubr.msk.bf16.mxu0 %vm1406_vm0, %v1405_v0  ;;  %v1273_v4 = vld [vmem:[%s1600_s10 + $0x38] sm:$0xff]   ;;  %v1274_v5 = vld [vmem:[%s1600_s10 + $0x70] sm:$0xff]   ;;  %v1276_v7 = vld [vmem:[%s1600_s10 + $0x68] sm:$0xff]   ;;  %p1713_p13 = scmp.ne.s32.totalorder %s1708_s12, 0 }
  0x4b   : > { %s1616_s8 = scalar_select %p385_p10, %s1466_s28, 1  ;;  %1156 = vmatprep.subr.bf16.mxu1 %v1272_v3  ;;  %v1275_v6 = vld [vmem:[%s1600_s10 + $0x30] sm:$0xff]   ;;  %v1277_v8 = vld [vmem:[%s1600_s10 + $0x28] sm:$0xff]   ;;  %v1278_v9 = vld [vmem:[%s1600_s10 + $0x60] sm:$0xff]  }
  0x4c   : > { %1157 = vmatpush3.bf16.msra.mxu1 %v1273_v4  ;;  %v1279_v10 = vld [vmem:[%s1600_s10 + $0x20] sm:$0xff]   ;;  %v1280_v11 = vld [vmem:[%s1600_s10 + $0x58] sm:$0xff]   ;;  %v1282_v13 = vld [vmem:[%s1600_s10 + $0x50] sm:$0xff]   ;;  %s1147_s19 = sshll.u32 (%p1713_p13), %s1466_s28, 3 }
  0x4d   : > { %s1152_s17 = sshll.u32 %s1616_s8, 3  ;;  %1158 = vmatprep.subr.bf16.mxu1 %v1274_v5  ;;  %v1281_v12 = vld [vmem:[%s1600_s10 + $0x18] sm:$0xff]   ;;  %v1283_v14 = vld [vmem:[%s1600_s10 + $0x10] sm:$0xff]   ;;  %v1284_v15 = vld [vmem:[%s1600_s10 + $0x48] sm:$0xff]   ;;  %s397_s27 = scalar_lea.vmem %s1700_s3, %s1616_s8 }
  0x4e   : > { %s389_s11 = scalar_lea.vmem %s1697_s0, %s1152_s17  ;;  %s394_s13 = scalar_lea.vmem %s1698_s1, %s1152_s17  ;;  %v1285_v16 = vld [vmem:[%s1600_s10 + $0x8] sm:$0xff]   ;;  %v1286_v17 = vld [vmem:[%s1600_s10 + $0x40] sm:$0xff]   ;;  %v1288_v35 = vld [vmem:[%s1607_s23 + $0x78] sm:$0xff]  }
  0x4f   : > { %v1270_v1 = vld [vmem:[%s394_s13] sm:$0xff]   ;;  %v1289_v37 = vld [vmem:[%s1607_s23 + $0x38] sm:$0xff]   ;;  %v1290_v38 = vld [vmem:[%s1607_s23 + $0x70] sm:$0xff]   ;;  %s1101_s17 = sshll.u32 %s1596_s20, 4  ;;  %s924_s18 = scalar_lea.vmem (%p1713_p13), %s1704_s7, %s1147_s19 }
  0x50   : > { %v1625_v2 = vld [vmem:[%s389_s11] sm:$0xff]   ;;  %1205 = vmatpush3.bf16.msra.mxu0 %v1270_v1  ;;  %630 = vmatprep.mubr.bf16.mxu1 %v1270_v1  ;;  %v1291_v39 = vld [vmem:[%s1607_s23 + $0x30] sm:$0xff]   ;;  %v1292_v40 = vld [vmem:[%s1607_s23 + $0x68] sm:$0xff]  }
  0x51   : > { %1210 = vmatprep.subr.bf16.mxu0 %v1405_v0  ;;  %1159 = vmatpush3.bf16.msra.mxu1 %v1275_v6  ;;  %v1287_v18 = vld [vmem:[%s1600_s10] sm:$0xff]   ;;  %v1293_v41 = vld [vmem:[%s1607_s23 + $0x28] sm:$0xff]   ;;  %v1296_v44 = vld [vmem:[%s1607_s23 + $0x58] sm:$0xff]   ;;  %s400_s10 = scalar_lea.vmem %s1702_s5, %s1616_s8  ;;  %s384_s8 = scalar_lea.vmem [#allocation6], %s1101_s17 }
  0x52   : > { %1160 = vmatprep.subr.bf16.mxu1 %v1276_v7  ;;  %v1109_v27 = vld [vmem:[%s397_s27] ss:$0 sm:$0xff]  ;;  %v1297_v45 = vld [vmem:[%s1607_s23 + $0x18] sm:$0xff]   ;;  %v1298_v46 = vld [vmem:[%s1607_s23 + $0x50] sm:$0xff]  }
  0x53   : > { %1207 = vmatmul.mubr.msk.bf16.vlgmr.msra.gmra.mxu0 %vm450_vm1, %v1625_v2  ;;  %v1294_v42 = vld [vmem:[%s1607_s23 + $0x60] sm:$0xff]   ;;  %v1299_v47 = vld [vmem:[%s1607_s23 + $0x10] sm:$0xff]   ;;  %v1300_v48 = vld [vmem:[%s1607_s23 + $0x48] sm:$0xff]  }
  0x54   : > { %1212 = vmatprep.mubr.msk.bf16.mxu0 %vm1406_vm0, %v1405_v0  ;;  %v1295_v43 = vld [vmem:[%s1607_s23 + $0x20] sm:$0xff]   ;;  %v1301_v49 = vld [vmem:[%s1607_s23 + $0x8] sm:$0xff]  }
  0x55   : > { %1161 = vmatpush3.bf16.msra.mxu1 %v1277_v8  ;;  %v1302_v50 = vld [vmem:[%s1607_s23 + $0x40] sm:$0xff]  }
  0x56   : > { %1162 = vmatprep.subr.bf16.mxu1 %v1278_v9  ;;  %v1303_v51 = vld [vmem:[%s1607_s23] sm:$0xff]  }
  0x57   : > { %v1127_v60 = vld [vmem:[%s400_s10] ss:$0 sm:$0xff] }
  0x58   : > { %v1304_v5 = vld [vmem:[%s1703_s6] sm:$0xff]  }
  0x59   : > { %1163 = vmatpush3.bf16.msra.mxu1 %v1279_v10 }
  0x5a   : > { %1164 = vmatprep.subr.bf16.mxu1 %v1280_v11 }
  0x5d   : > { %1165 = vmatpush3.bf16.msra.mxu1 %v1281_v12 }
  0x5e   : > { %1166 = vmatprep.subr.bf16.mxu1 %v1282_v13 }
  0x61   : > { %1167 = vmatpush3.bf16.msra.mxu1 %v1283_v14 }
  0x62   : > { %1168 = vmatprep.subr.bf16.mxu1 %v1284_v15 }
  0x65   : > { %1169 = vmatpush3.bf16.msra.mxu1 %v1285_v16 }
  0x66   : > { %1170 = vmatprep.subr.bf16.mxu1 %v1286_v17 }
  0x69   : > { %1171 = vmatpush3.bf16.msra.mxu1 %v1287_v18 }
  0x6a   : > { %1216 = vmatprep.subr.bf16.mxu1 %v1405_v0 }
 0x113   : > { %v488_v19 = vpop.f32.mrf.mxu0 }
 0x115   : > { %v1208_v20 = vpop.f32.mrf.mxu0 }
 0x117   : > { %v491_v21 = vpop.f32.mrf.mxu0 }
 0x118   : > { %v495_v22 = vpack.c.bf16 %v491_v21, %v488_v19 }
 0x119   : > { %v1209_v23 = vpop.f32.mrf.mxu0 }
 0x11a   : > { %631 = vmatmul.mubr.bf16.vlgmr.msra.gmra.mxu1 %v495_v22 }
 0x11b   : > { %1218 = vmatprep.mubr.msk.bf16.mxu1 %vm1406_vm0, %v1405_v0 }
 0x1da   : > { %v1172_v24 = vpop.f32.mrf.mxu1 }
 0x1dc   : > { %v1173_v25 = vpop.f32.mrf.mxu1 }
 0x1dd   : > { %v1174_v26 = vadd.f32 %v1173_v25, %v1172_v24 }
 0x1de   : > { %v1175_v28 = vpop.f32.mrf.mxu1 }
 0x1df   : > { %v633_v30 = vadd.f32 %v1174_v26, %v1109_v27 }
 0x1e0   : > { %v1176_v29 = vpop.f32.mrf.mxu1 }
 0x1e1   : > { %v1177_v31 = vadd.f32 %v1176_v29, %v1175_v28  ;;  %v639_v33 = vmax.f32 %v633_v30, 0.0 }
 0x1e3   : > { %v636_v32 = vadd.f32 %v1177_v31, %v1109_v27 }
 0x1e5   : > { %v640_v34 = vmax.f32 %v636_v32, 0.0 }
 0x1e7   : > { %v641_v36 = vpack.c.bf16 %v640_v34, %v639_v33 }
 0x1e9   : > { %1211 = vmatpush3.bf16.msra.mxu0 %v641_v36 }
 0x1ea   : > { %1180 = vmatprep.subr.bf16.mxu0 %v1288_v35 }
 0x1ec   : > { %1213 = vmatmul.mubr.msk.bf16.vlgmr.msra.gmra.mxu0 %vm450_vm1, %v1625_v2 }
 0x1ed   : > { %851 = vmatprep.mubr.bf16.mxu0 %v641_v36  ;;  %1181 = vmatpush3.bf16.msra.mxu0 %v1289_v37 }
 0x1ee   : > { %1182 = vmatprep.subr.bf16.mxu0 %v1290_v38 }
 0x1f1   : > { %1183 = vmatpush3.bf16.msra.mxu0 %v1291_v39 }
 0x1f2   : > { %1184 = vmatprep.subr.bf16.mxu0 %v1292_v40 }
 0x1f5   : > { %1185 = vmatpush3.bf16.msra.mxu0 %v1293_v41 }
 0x1f6   : > { %1186 = vmatprep.subr.bf16.mxu0 %v1294_v42 }
 0x1f9   : > { %1187 = vmatpush3.bf16.msra.mxu0 %v1295_v43 }
 0x1fa   : > { %1188 = vmatprep.subr.bf16.mxu0 %v1296_v44 }
 0x1fd   : > { %1189 = vmatpush3.bf16.msra.mxu0 %v1297_v45 }
 0x1fe   : > { %1190 = vmatprep.subr.bf16.mxu0 %v1298_v46 }
 0x201   : > { %1191 = vmatpush3.bf16.msra.mxu0 %v1299_v47 }
 0x202   : > { %1192 = vmatprep.subr.bf16.mxu0 %v1300_v48 }
 0x205   : > { %1193 = vmatpush3.bf16.msra.mxu0 %v1301_v49 }
 0x206   : > { %1194 = vmatprep.subr.bf16.mxu0 %v1302_v50 }
 0x209   : > { %1195 = vmatpush3.bf16.msra.mxu0 %v1303_v51 }
 0x2ac   : > { %v709_v52 = vpop.f32.mrf.mxu0 }
 0x2ae   : > { %v1214_v53 = vpop.f32.mrf.mxu0 }
 0x2b0   : > { %v712_v54 = vpop.f32.mrf.mxu0 }
 0x2b1   : > { %v716_v55 = vpack.c.bf16 %v712_v54, %v709_v52 }
 0x2b2   : > { %v1215_v56 = vpop.f32.mrf.mxu0 }
 0x2b3   : > { %852 = vmatmul.mubr.bf16.vlgmr.msra.gmra.mxu0 %v716_v55 }
 0x373   : > { %v1196_v57 = vpop.f32.mrf.mxu0 }
 0x375   : > { %v1197_v58 = vpop.f32.mrf.mxu0 }
 0x376   : > { %v1198_v59 = vadd.f32 %v1197_v58, %v1196_v57 }
 0x377   : > { %v1199_v61 = vpop.f32.mrf.mxu0 }
 0x378   : > { %v854_v63 = vadd.f32 %v1198_v59, %v1127_v60 }
 0x379   : > { %v1200_v62 = vpop.f32.mrf.mxu0 }
 0x37a   : > { %v1201_v0 = vadd.f32 %v1200_v62, %v1199_v61  ;;  %v860_v2 = vmax.f32 %v854_v63, 0.0 }
 0x37c   : > { %v857_v1 = vadd.f32 %v1201_v0, %v1127_v60 }
 0x37e   : > { %v861_v3 = vmax.f32 %v857_v1, 0.0 }
 0x380   : > { %v862_v4 = vpack.c.bf16 %v861_v3, %v860_v2 }
 0x382   : > { %1217 = vmatpush3.bf16.msra.mxu1 %v862_v4 }
 0x385   : > { %1219 = vmatmul.mubr.msk.bf16.vlgmr.msra.gmra.mxu1 %vm450_vm1, %v1304_v5 }
 0x445   : > { %v907_v6 = vpop.f32.mrf.mxu1 }
 0x446   : > { %914 = vst [vmem:[%s384_s8] sm:$0xff] %v907_v6 }
 0x447   : > { %v1220_v7 = vpop.f32.mrf.mxu1  ;;  %922 = sbr.rel (!%p1713_p13) target bundleno = 1107 (0x453), region = 60 }
 0x449   : > { %v910_v8 = vpop.f32.mrf.mxu1 }
 0x44a   : > { %915 = vst [vmem:[%s384_s8 + $0x8] sm:$0xff] %v910_v8 }
 0x44b   : > { %v1221_v9 = vpop.f32.mrf.mxu1 }
 0x44d   : > { %v955_v10 = vld [vmem:[%s384_s8] sm:$0xff] }
 0x44e   : > { %956 = vst [vmem:[%s924_s18] sm:$0xff] %v955_v10 }
 0x451   : > { %v957_v11 = vld [vmem:[%s384_s8 + $0x8] sm:$0xff] }
 0x452   : > { %958 = vst [vmem:[%s924_s18 + $0x10] sm:$0xff] %v957_v11 }
 0x453 PF: > { %p20_p1 = scmp.ge.s32.totalorder %s1469_s29, 4   ;;  %s1714_s24 = smov %s1391_s25 }
 0x454   : > { %s1715_s25 = smov %s1395_s26  ;;  %s1716_s26 = smov %s1479_s9 }
 0x455   : > { %s1717_s27 = smov %s1469_s29  ;;  %22 = sbr.rel (!%p20_p1) target bundleno = 5 (0x5), region = 151 }
 0x45a   :  { %974 = vsyncpa [#allocation3], 1 }
 0x45b   :  { %976 = vsyncpa [#allocation3 + $0x1], 1 }
 0x45c   :  { %977 = vsyncpa [#allocation5], 1 }
 0x45d   :  { %979 = vsyncpa [#allocation5 + $0x1], 1 }

</bundles_post_ra>
